<compile_context>
chip_gen: v6e
topology: v6e:2x2x1
jax: 0.10.0
libtpu: 0.0.40
codegen_flags: <defaults>
</compile_context>

<pallas_src>
import functools

import jax
import jax.numpy as jnp
import numpy as np
from jax.experimental import pallas as pl
from jax.experimental.pallas import tpu as pltpu


def _conv_bias_relu_kernel(w_ref, b_ref, p_ref, o_ref, *, relu):
    """Fused conv-as-matmul + bias (+ ReLU).

    w_ref : (Cout, K)     flattened conv weights, K = kh*kw*Cin
    b_ref : (Cout, 1)     conv bias (f32)
    p_ref : (K, tile)     im2col patches, tile columns of the N*Ho*Wo axis
    o_ref : (Cout, tile)  output block (lane-dense)
    """
    acc = jnp.dot(w_ref[...], p_ref[...], preferred_element_type=jnp.float32)
    acc = acc + b_ref[...]                 # (Cout, tile) + (Cout, 1), f32
    if relu:
        acc = jnp.maximum(acc, 0.0)
    o_ref[...] = acc.astype(o_ref.dtype)


def conv2d_bias_relu_pallas(x_nchw, w_oihw, bias, *, stride, padding,
                            relu=True, matmul_dtype=jnp.bfloat16,
                            lane_tile=512):
    """conv (kxk, bias=True) + ReLU.  x: (N, Cin, H, W) NCHW, w: OIHW.

    Returns (N, Cout, Ho, Wo) NCHW, matching nn.Conv2d semantics.
    """
    N, Cin, H, W = x_nchw.shape
    Cout, _, kh, kw = w_oihw.shape
    Ho = (H + 2 * padding - kh) // stride + 1
    Wo = (W + 2 * padding - kw) // stride + 1
    P = Ho * Wo
    K = kh * kw * Cin
    NP = N * P

    # ---- layout glue (XLA side): im2col with taps folded into K -------------
    xp = jnp.pad(x_nchw,
                 ((0, 0), (0, 0), (padding, padding), (padding, padding)))
    taps = []
    for dy in range(kh):
        for dx in range(kw):
            taps.append(xp[:, :,
                           dy:dy + stride * (Ho - 1) + 1:stride,
                           dx:dx + stride * (Wo - 1) + 1:stride])
    xt = jnp.stack(taps, axis=0)                       # (T, N, Cin, Ho, Wo)
    patches = xt.transpose(0, 2, 1, 3, 4).reshape(K, NP)
    w_f = w_oihw.transpose(0, 2, 3, 1).reshape(Cout, K)

    patches = patches.astype(matmul_dtype)
    w_f = w_f.astype(matmul_dtype)
    b2 = bias.reshape(Cout, 1).astype(jnp.float32)

    # Lane-dense tiling of the flattened (batch*spatial) axis.
    np_pad = -(-NP // 128) * 128
    tile = min(lane_tile, np_pad)
    np_pad = -(-np_pad // tile) * tile
    if np_pad != NP:
        patches = jnp.pad(patches, ((0, 0), (0, np_pad - NP)))
    grid = (np_pad // tile,)

    out = pl.pallas_call(
        functools.partial(_conv_bias_relu_kernel, relu=relu),
        out_shape=jax.ShapeDtypeStruct((Cout, np_pad), x_nchw.dtype),
        grid=grid,
        in_specs=[
            pl.BlockSpec((Cout, K), lambda i: (0, 0)),   # weights, resident
            pl.BlockSpec((Cout, 1), lambda i: (0, 0)),   # bias, resident
            pl.BlockSpec((K, tile), lambda i: (0, i)),   # patches, streamed
        ],
        out_specs=pl.BlockSpec((Cout, tile), lambda i: (0, i)),
        compiler_params=pltpu.CompilerParams(
            dimension_semantics=("parallel",)),
    )(w_f, b2, patches)

    out = out[:, :NP].reshape(Cout, N, Ho, Wo)
    return jnp.transpose(out, (1, 0, 2, 3))            # (N, Cout, Ho, Wo)


def plain_no_bn_block_pallas(x_nchw, params, *, stride=1,
                             matmul_dtype=jnp.bfloat16):
    """Pallas forward of PlainNoBNBlock: relu(conv3x3(x, stride, pad=1) + b)."""
    return conv2d_bias_relu_pallas(x_nchw, params["w"], params["b"],
                                   stride=stride, padding=1, relu=True,
                                   matmul_dtype=matmul_dtype)


# ---------------------- pure-JAX reference (for checking) ----------------------
def plain_no_bn_block_ref(x_nchw, params, *, stride=1):
    y = jax.lax.conv_general_dilated(
        x_nchw, params["w"], (stride, stride), [(1, 1), (1, 1)],
        dimension_numbers=("NCHW", "OIHW", "NCHW"))
    y = y + params["b"].reshape(1, -1, 1, 1)
    return jnp.maximum(y, 0.0)


# ----------------------------- parameter init ----------------------------------
def init_params(key, in_planes, planes):
    kw, kb = jax.random.split(key, 2)
    return {
        "w": 0.1 * jax.random.normal(kw, (planes, in_planes, 3, 3), jnp.float32),
        "b": 0.1 * jax.random.normal(kb, (planes,), jnp.float32),
    }


if __name__ == "__main__":
    key = jax.random.PRNGKey(0)
    kx, kp1, kp2 = jax.random.split(key, 3)

    N, Cin, H, W = 2, 4, 16, 16
    x = jax.random.normal(kx, (N, Cin, H, W), jnp.float32)

    # Config 1: stride=1, 4 -> 8 channels (default bf16 matmul path).
    planes, stride = 8, 1
    p1 = init_params(kp1, Cin, planes)
    out1 = jax.block_until_ready(plain_no_bn_block_pallas(x, p1, stride=stride))
    ref1 = plain_no_bn_block_ref(x, p1, stride=stride)
    assert out1.shape == (N, planes, H, W)
    np.testing.assert_allclose(np.asarray(out1), np.asarray(ref1),
                               rtol=2e-2, atol=2e-2)

    # Same config, f32 matmul path (tight-tolerance exactness check).
    out1f = jax.block_until_ready(
        plain_no_bn_block_pallas(x, p1, stride=stride,
                                 matmul_dtype=jnp.float32))
    np.testing.assert_allclose(np.asarray(out1f), np.asarray(ref1),
                               rtol=1e-4, atol=1e-4)

    # Config 2: downsampling, stride=2, 4 -> 8 channels.
    planes2, stride2 = 8, 2
    p2 = init_params(kp2, Cin, planes2)
    out2 = jax.block_until_ready(plain_no_bn_block_pallas(x, p2, stride=stride2))
    ref2 = plain_no_bn_block_ref(x, p2, stride=stride2)
    assert out2.shape == (N, planes2, H // 2, W // 2)
    np.testing.assert_allclose(np.asarray(out2), np.asarray(ref2),
                               rtol=2e-2, atol=2e-2)

    print("KERNEL_OK")
</pallas_src>

<mosaic_0001>
module attributes {stable_mosaic.version = 11 : i64} {
  func.func @_conv_bias_relu_kernel(%arg0: i32, %arg1: memref<8x36xbf16, #tpu.memory_space<vmem>>, %arg2: memref<8x1xf32, #tpu.memory_space<vmem>>, %arg3: memref<36x512xbf16, #tpu.memory_space<vmem>>, %arg4: memref<8x512xf32, #tpu.memory_space<vmem>>) attributes {dimension_semantics = [#tpu.dimension_semantics<parallel>], iteration_bounds = array<i64: 1>, scalar_prefetch = 0 : i64, scratch_operands = 0 : i64, tpu.core_type = #tpu.core_type<tc>, window_params = [{pipeline_mode = #tpu.pipeline_mode<synchronous>, transform_indices = @transform_0, window_bounds = array<i64: 8, 36>}, {pipeline_mode = #tpu.pipeline_mode<synchronous>, transform_indices = @transform_1, window_bounds = array<i64: 8, 1>}, {transform_indices = @transform_2, window_bounds = array<i64: 36, 512>}, {transform_indices = @transform_3, window_bounds = array<i64: 8, 512>}]} {
    %c0 = arith.constant 0 : index
    %c0_0 = arith.constant 0 : index
    %0 = vector.load %arg1[%c0, %c0_0] : memref<8x36xbf16, #tpu.memory_space<vmem>>, vector<8x36xbf16>
    %c0_1 = arith.constant 0 : index
    %c0_2 = arith.constant 0 : index
    %1 = vector.load %arg3[%c0_1, %c0_2] : memref<36x512xbf16, #tpu.memory_space<vmem>>, vector<36x512xbf16>
    %cst = arith.constant dense<0.000000e+00> : vector<8x512xf32>
    %2 = tpu.matmul %0, %1, %cst {dimension_numbers = #tpu.dot_dimension_numbers<[1], [0], [0], [1], [0, 0, 1, 1], [], []>} : vector<8x36xbf16>, vector<36x512xbf16>, vector<8x512xf32> -> vector<8x512xf32>
    %c0_3 = arith.constant 0 : index
    %c0_4 = arith.constant 0 : index
    %3 = vector.load %arg2[%c0_3, %c0_4] : memref<8x1xf32, #tpu.memory_space<vmem>>, vector<8x1xf32>
    %4 = vector.broadcast %3 : vector<8x1xf32> to vector<8x512xf32>
    %5 = arith.addf %2, %4 : vector<8x512xf32>
    %cst_5 = arith.constant 0.000000e+00 : f32
    %6 = vector.broadcast %cst_5 : f32 to vector<8x512xf32>
    %7 = arith.maximumf %5, %6 : vector<8x512xf32>
    %c0_6 = arith.constant 0 : index
    %c0_7 = arith.constant 0 : index
    %8 = vector.load %arg4[%c0_6, %c0_7] : memref<8x512xf32, #tpu.memory_space<vmem>>, vector<8x512xf32>
    tpu.vector_store %arg4[%c0_6, %c0_7], %7 {strides = array<i32>} : memref<8x512xf32, #tpu.memory_space<vmem>>, vector<8x512xf32>,
    return
  }
  func.func @transform_0(%arg0: i32) -> (i32, i32) {
    %c0_i32 = arith.constant 0 : i32
    %c0_i32_0 = arith.constant 0 : i32
    %c0_i32_1 = arith.constant 0 : i32
    return %c0_i32, %c0_i32_0 : i32, i32
  }
  func.func @transform_1(%arg0: i32) -> (i32, i32) {
    %c0_i32 = arith.constant 0 : i32
    %c0_i32_0 = arith.constant 0 : i32
    %c0_i32_1 = arith.constant 0 : i32
    return %c0_i32, %c0_i32_0 : i32, i32
  }
  func.func @transform_2(%arg0: i32) -> (i32, i32) {
    %c0_i32 = arith.constant 0 : i32
    %c0_i32_0 = arith.constant 0 : i32
    return %c0_i32, %arg0 : i32, i32
  }
  func.func @transform_3(%arg0: i32) -> (i32, i32) {
    %c0_i32 = arith.constant 0 : i32
    %c0_i32_0 = arith.constant 0 : i32
    return %c0_i32, %arg0 : i32, i32
  }
}

</mosaic_0001>

<bundles_post_ra>
// kernel: tpu_custom_call.1
= control target key start
LH: loop header
LB: loop body
LE: loop exit
PB: predicated region body
PF: predicated region fallthrough
CT: control target
= control target key end

     0   :  { %8 = vsyncpa [#allocation3], 0  ;;  %s338_s0 = inlined_call_operand.vmem [shape: bf16[8,36], index: 0, kind: input, shape index: {}]   ;;  %s339_s1 = inlined_call_operand.vmem [shape: f32[8,1], index: 1, kind: input, shape index: {}]   ;;  %s340_s2 = inlined_call_operand.hbm [shape: bf16[36,512], index: 2, kind: input, shape index: {}]   ;;  %s341_s3 = inlined_call_operand.hbm [shape: f32[8,512], index: 3, kind: output, shape index: {}]  }
   0x1   :  { %9 = vsyncpa [#allocation4], 0  ;;  %s301_s12 = smov [#allocation2]  }
   0x2   :  { %s19_s13 = sshll.u32 %s301_s12, 4  ;;  %s20_s13 = int_to_ptr.vmem [resolvable:$true] %s19_s13 }
   0x3   :  { %s265_s14 = scalar_lea.vmem %s20_s13, 1280  ;;  %p270_p1 = scmp.lt.s32.totalorder %s20_s13, %s20_s13 }
   0x4   :  { %p266_p0 = scmp.ne.s32.totalorder %s20_s13, %s265_s14  ;;  %p271_p2 = scmp.lt.s32.totalorder %s265_s14, %s265_s14 }
   0x6   :  { %p272_p3 = por %p271_p2, %p270_p1 }
   0x8   :  { %p273_p4 = pnand %p272_p3, %p266_p0 }
   0xa   :  { %276 = shalt.err (!%p273_p4)
}
   0xb   :  { %s302_s15 = smov 256   ;;  %s303_s16 = smov 16  }
   0xc   :  { %25 = dma.hbm_to_vmem [thread:$0]  %s340_s2, 1280, %s20_s13, [#allocation3], %s302_s15, %s302_s15, %s303_s16  }
   0xd   :  { %297 = dma.done.wait [#allocation3], 1280  }
   0xe   :  { %298 = vsyncadd [#allocation3], 4294966016  ;;  %v304_v0 = vmov 0   ;;  %v39_v1 = vld [vmem:[#allocation2 + $0x40] sm:$0x33]  ;;  %vm101_vm0 = vcmask 1041408  }
   0xf   :  { %146 = vmatprep.mubr.bf16.mxu0 %v304_v0  ;;  %187 = vmatprep.mubr.bf16.mxu1 %v304_v0  ;;  %v40_v2 = vld [vmem:[#allocation2 + $0x48] sm:$0x33]  ;;  %v228_v3 = vcombine.high %v39_v1, %v39_v1  ;;  %v227_v5 = vcombine.low %v39_v1, %v39_v1  ;;  %v245_v7 = vld [vmem:[#allocation2 + $0x24] ss:$16 sps:$4 sm:$0xff]   ;;  %v249_v11 = vld [vmem:[#allocation2 + $0x20] ss:$16 sps:$4 sm:$0xff]  }
  0x10   :  { %240 = vset.pattern.permute.xlu0 %v304_v0  ;;  %v230_v4 = vcombine.high %v40_v2, %v40_v2  ;;  %v229_v6 = vcombine.low %v40_v2, %v40_v2  ;;  %v247_v8 = vld [vmem:[#allocation2 + $0x2c] ss:$16 sps:$4 sm:$0xff]   ;;  %v250_v12 = vld [vmem:[#allocation2 + $0x28] ss:$16 sps:$4 sm:$0xff]   ;;  %v251_v13 = vld [vmem:[#allocation2 + $0x4] ss:$16 sps:$4 sm:$0xff]  }
  0x11   :  { %231 = vmatprep.subr.msk.bf16.mxu0 %vm101_vm0, %v228_v3  ;;  %v103_v9 = vsel %vm101_vm0, %v227_v5, 0  ;;  %v253_v14 = vld [vmem:[#allocation2 + $0xc] ss:$16 sps:$4 sm:$0xff]   ;;  %v41_v15 = vld [vmem:[%s339_s1] sm:$0xff]  ;;  %v256_v17 = vld [vmem:[#allocation2 + $0x8] ss:$16 sps:$4 sm:$0xff]  }
  0x12   :  { %233 = vmatprep.subr.msk.bf16.mxu1 %vm101_vm0, %v230_v4  ;;  %v109_v10 = vsel %vm101_vm0, %v229_v6, 0  ;;  %125 = vmatpush1.bf16.msra.mxu0 %v103_v9  ;;  %v255_v16 = vld [vmem:[#allocation2] ss:$16 sps:$4 sm:$0xff]   ;;  %vm97_vm1 = vcmask 293888   ;;  %s305_s1 = smov [#allocation5]  }
  0x13   :  { %166 = vmatpush1.bf16.msra.mxu1 %v109_v10  ;;  %126 = vmatprep.subr.bf16.mxu0 %v245_v7  ;;  %v30_v18 = vld [vmem:[%s338_s0] sm:$0xf]  ;;  %s210_s22 = sshll.u32 %s305_s1, 4  ;;  %s211_s22 = int_to_ptr.vmem [resolvable:$true] %s210_s22 }
  0x14   :  { %167 = vmatprep.subr.bf16.mxu1 %v247_v8  ;;  %44 = vperm.xlu0 %240, %v41_v15   ;;  %s277_s0 = scalar_lea.vmem %s211_s22, 512  ;;  %p282_p6 = scmp.lt.s32.totalorder %s211_s22, %s211_s22 }
  0x15   :  { %p278_p5 = scmp.ne.s32.totalorder %s211_s22, %s277_s0  ;;  %p283_p7 = scmp.lt.s32.totalorder %s277_s0, %s277_s0 }
  0x16   :  { %127 = vmatpush1.bf16.msra.mxu0 %v249_v11 }
  0x17   :  { %168 = vmatpush1.bf16.msra.mxu1 %v250_v12  ;;  %128 = vmatprep.subr.bf16.mxu0 %v251_v13  ;;  %p284_p8 = por %p283_p7, %p282_p6 }
  0x18   :  { %169 = vmatprep.subr.bf16.mxu1 %v253_v14 }
  0x19   :  { %p285_p9 = pnand %p284_p8, %p278_p5 }
  0x1a   :  { %129 = vmatpush1.bf16.msra.mxu0 %v255_v16 }
  0x1b   :  { %170 = vmatpush1.bf16.msra.mxu1 %v256_v17 }
  0x1d   :  { %232 = vmatmul.mubr.msk.bf16.vlgmr.msra.gmra.mxu0 %vm97_vm1, %v30_v18 }
  0x1e   :  { %234 = vmatmul.mubr.msk.bf16.vlgmr.msra.gmra.mxu1 %vm97_vm1, %v30_v18 }
  0x8f   :  { %v45_v19 = vpop.permute.xlu0 %44 }
  0xdd   :  { %v148_v20 = vpop.f32.mrf.mxu0 }
  0xde   :  { %v189_v21 = vpop.f32.mrf.mxu1  ;;  %v149_v22 = vadd.f32 %v148_v20, %v45_v19 }
  0xdf   :  { %v190_v23 = vadd.f32 %v189_v21, %v45_v19  ;;  %v150_v24 = vpop.f32.mrf.mxu0 }
  0xe0   :  { %v191_v25 = vpop.f32.mrf.mxu1  ;;  %v196_v26 = vmax.f32 %v149_v22, 0.0  ;;  %v151_v28 = vadd.f32 %v150_v24, %v45_v19 }
  0xe1   :  { %v198_v27 = vmax.f32 %v190_v23, 0.0  ;;  %v192_v29 = vadd.f32 %v191_v25, %v45_v19  ;;  %v152_v30 = vpop.f32.mrf.mxu0 }
  0xe2   :  { %v193_v31 = vpop.f32.mrf.mxu1  ;;  %200 = vst [vmem:[#allocation5] sm:$0xff] %v196_v26  ;;  %v197_v32 = vmax.f32 %v151_v28, 0.0 }
  0xe3   :  { %202 = vst [vmem:[#allocation5 + $0x10] sm:$0xff] %v198_v27  ;;  %v199_v33 = vmax.f32 %v192_v29, 0.0  ;;  %v153_v34 = vpop.f32.mrf.mxu0 }
  0xe4   :  { %v194_v35 = vpop.f32.mrf.mxu1  ;;  %201 = vst [vmem:[#allocation5 + $0x8] sm:$0xff] %v197_v32 }
  0xe5   :  { %203 = vst [vmem:[#allocation5 + $0x18] sm:$0xff] %v199_v33 }
  0xe6   :  { %288 = shalt.err (!%p285_p9)
}
  0xe7   :  { %213 = dma.vmem_to_hbm [thread:$0]  %s211_s22, 512, %s341_s3, [#allocation4]  }
  0xe8   :  { %299 = dma.done.wait [#allocation4], 512  }
  0xe9   :  { %300 = vsyncadd [#allocation4], 4294966784 }
  0xea   :  { %217 = vsyncpa [#allocation3], 1 }
  0xeb   :  { %218 = vsyncpa [#allocation4], 1 }

</bundles_post_ra>
